<compile_context>
chip_gen: v7x
topology: tpu7x:2x2x1
jax: 0.10.0
libtpu: 0.0.40
codegen_flags: <defaults>
</compile_context>

<pallas_src>
import functools

import jax
import jax.numpy as jnp
from jax.experimental import pallas as pl
from jax.experimental.pallas import tpu as pltpu


# ---------------------------------------------------------------------------
# Pallas kernels
# ---------------------------------------------------------------------------
def _conv_stats_kernel(x_ref, w_ref, b_ref, y_ref, sum_ref, sq_ref,
                       *, n_valid, tn, shard_steps, needs_mask):
    """(Cout_p, K_p) @ (K_p, TN) 1x1 conv + per-channel sum / sum-of-squares.

    Grid = (shards, steps). Stats accumulate over the trailing ("arbitrary")
    axis into a per-shard resident block; partial shards are combined outside.
    """
    j = pl.program_id(1)

    @pl.when(j == 0)
    def _():
        sum_ref[...] = jnp.zeros_like(sum_ref)
        sq_ref[...] = jnp.zeros_like(sq_ref)

    # bf16 operands on the MXU, f32 accumulation.
    y = jnp.dot(w_ref[...], x_ref[...], preferred_element_type=jnp.float32)
    y = y + b_ref[...]                       # (Cout_p, TN) + (Cout_p, 1)
    y_ref[...] = y.astype(y_ref.dtype)       # bf16 intermediate (halves HBM traffic)

    if needs_mask:
        # Exclude padded pixel columns from the BatchNorm statistics.
        c = pl.program_id(0)
        col0 = (c * shard_steps + j) * tn
        col = col0 + jax.lax.broadcasted_iota(jnp.int32, y.shape, 1)
        y = jnp.where(col < n_valid, y, 0.0)

    sum_ref[...] += jnp.sum(y, axis=1, keepdims=True)        # f32 stats
    sq_ref[...] += jnp.sum(y * y, axis=1, keepdims=True)


def _bn_act_kernel(y_ref, scale_ref, shift_ref, o_ref, *, neg_slope):
    """In-place BatchNorm affine (precomputed scale/shift) + LeakyReLU."""
    y = y_ref[...].astype(jnp.float32)
    z = y * scale_ref[...] + shift_ref[...]                   # single FMA, lane bcast
    o_ref[...] = jnp.where(z > 0, z, neg_slope * z).astype(o_ref.dtype)


# ---------------------------------------------------------------------------
# JAX glue
# ---------------------------------------------------------------------------
def _round_up(x, m):
    return (x + m - 1) // m * m


def _pick_tile(n, shards=1, candidates=(2048, 1024, 512, 256, 128)):
    """Largest pixel tile such that n % (shards * tile) == 0 (n is a multiple of 256)."""
    for t in candidates:
        if n % (shards * t) == 0:
            return t
    raise ValueError(f"no tile for n={n}, shards={shards}")


def hanc_features(x, k):
    """Reproduces the concat-along-H + view trick of the PyTorch forward.

    x: (B, C, H, W) -> (B, (2k-1)*C, H, W) with channel ordering
    c' = c*(2k-1) + j, j in [identity, avg@2..2^(k-1), max@2..2^(k-1)].
    """
    # TODO(synk): fuse this pooled/upsampled feature construction into the conv
    # kernel (build the K channels per tile) to avoid materializing the
    # (2k-1)x expanded tensor in HBM.
    B, C, H, W = x.shape
    assert H % (2 ** (k - 1)) == 0 and W % (2 ** (k - 1)) == 0, \
        "H, W must be divisible by 2**(k-1) for HANC pooling"
    avg_feats, max_feats = [], []
    for i in range(1, k):
        s = 2 ** i
        xr = x.reshape(B, C, H // s, s, W // s, s)
        avg = xr.mean(axis=(3, 5))
        mx = xr.max(axis=(3, 5))
        # nn.Upsample(scale_factor=s) default mode='nearest'
        avg_feats.append(jnp.repeat(jnp.repeat(avg, s, axis=2), s, axis=3))
        max_feats.append(jnp.repeat(jnp.repeat(mx, s, axis=2), s, axis=3))
    stacked = jnp.stack([x] + avg_feats + max_feats, axis=2)  # (B, C, 2k-1, H, W)
    return stacked.reshape(B, C * (2 * k - 1), H, W)


def hanc_layer(x, conv_w, conv_b, gamma, beta, *, k, eps=1e-5, neg_slope=0.01):
    """Forward pass of HANCLayer. x: (B, C_in, H, W) NCHW float32 -> (B, C_out, H, W)."""
    B, C, H, W = x.shape
    K = (2 * k - 1) * C
    Cout = conv_w.shape[0]
    assert conv_w.shape == (Cout, K, 1, 1)

    feat = hanc_features(x, k)                                 # (B, K, H, W)
    N = B * H * W

    # Channel-major (K, N) layout: pixels in lanes (lane-dense), channels in
    # sublanes; only swaps the small B and K axes instead of a full NCHW->NHWC
    # transpose in HBM.
    X = feat.reshape(B, K, H * W).transpose(1, 0, 2).reshape(K, N)

    # Pad channel dims to sublane multiples; pad the pixel dim to the tile grid.
    # (For production channel widths, pad K/Cout toward 128/256 for the MXU.)
    K_p = _round_up(K, 8)
    Cout_p = _round_up(Cout, 8)
    G0 = 2                                     # stat shards (megacore on v7x; harmless on 1-TC chips)
    N_p = _round_up(N, G0 * 128)

    X = jnp.pad(X, ((0, K_p - K), (0, N_p - N))).astype(jnp.bfloat16)
    Wm = jnp.pad(conv_w[:, :, 0, 0],
                 ((0, Cout_p - Cout), (0, K_p - K))).astype(jnp.bfloat16)
    b_col = jnp.pad(conv_b, (0, Cout_p - Cout)).reshape(Cout_p, 1).astype(jnp.float32)

    TN1 = _pick_tile(N_p, G0)                  # large tiles: mem-bound kernels
    G1 = N_p // (G0 * TN1)

    # --- kernel 1: conv matmul (bf16 -> f32 acc) + BN statistics -------------
    kernel1 = functools.partial(_conv_stats_kernel, n_valid=N, tn=TN1,
                                shard_steps=G1, needs_mask=(N_p != N))
    y, psum, psq = pl.pallas_call(
        kernel1,
        out_shape=(jax.ShapeDtypeStruct((Cout_p, N_p), jnp.bfloat16),
                   jax.ShapeDtypeStruct((G0, Cout_p, 1), jnp.float32),
                   jax.ShapeDtypeStruct((G0, Cout_p, 1), jnp.float32)),
        grid=(G0, G1),
        in_specs=[pl.BlockSpec((K_p, TN1), lambda c, j: (0, c * G1 + j)),
                  pl.BlockSpec((Cout_p, K_p), lambda c, j: (0, 0)),
                  pl.BlockSpec((Cout_p, 1), lambda c, j: (0, 0))],
        out_specs=(pl.BlockSpec((Cout_p, TN1), lambda c, j: (0, c * G1 + j)),
                   pl.BlockSpec((None, Cout_p, 1), lambda c, j: (c, 0, 0)),
                   pl.BlockSpec((None, Cout_p, 1), lambda c, j: (c, 0, 0))),
        compiler_params=pltpu.CompilerParams(
            dimension_semantics=("parallel", "arbitrary"),
            vmem_limit_bytes=32 * 1024 * 1024),
    )(X, Wm, b_col)

    # --- tiny per-channel BN math in plain JAX --------------------------------
    s1 = jnp.sum(psum, axis=0)                 # (Cout_p, 1)
    s2 = jnp.sum(psq, axis=0)
    inv_n = 1.0 / float(N)
    mean = s1 * inv_n
    var = jnp.maximum(s2 * inv_n - mean * mean, 0.0)   # clamp: E[y^2]-m^2 can dip <0
    g_col = jnp.pad(gamma, (0, Cout_p - Cout)).reshape(Cout_p, 1).astype(jnp.float32)
    be_col = jnp.pad(beta, (0, Cout_p - Cout)).reshape(Cout_p, 1).astype(jnp.float32)
    scale = g_col * jax.lax.rsqrt(var + eps)
    shift = be_col - mean * scale

    # --- kernel 2: in-place BN affine + LeakyReLU ------------------------------
    TN2 = _pick_tile(N_p, 1, candidates=(4096, 2048, 1024, 512, 256, 128))
    out = pl.pallas_call(
        functools.partial(_bn_act_kernel, neg_slope=neg_slope),
        out_shape=jax.ShapeDtypeStruct((Cout_p, N_p), jnp.bfloat16),
        grid=(N_p // TN2,),
        in_specs=[pl.BlockSpec((Cout_p, TN2), lambda i: (0, i)),
                  pl.BlockSpec((Cout_p, 1), lambda i: (0, 0)),
                  pl.BlockSpec((Cout_p, 1), lambda i: (0, 0))],
        out_specs=pl.BlockSpec((Cout_p, TN2), lambda i: (0, i)),
        input_output_aliases={0: 0},           # write over y in place
        compiler_params=pltpu.CompilerParams(
            dimension_semantics=("parallel",),
            vmem_limit_bytes=32 * 1024 * 1024),
    )(y, scale, shift)

    out = out[:Cout, :N].astype(jnp.float32)
    return out.reshape(Cout, B, H, W).transpose(1, 0, 2, 3)    # back to NCHW


# ---------------------------------------------------------------------------
# Pure-JAX reference (for a sanity check)
# ---------------------------------------------------------------------------
def reference(x, conv_w, conv_b, gamma, beta, *, k, eps=1e-5, neg_slope=0.01):
    feat = hanc_features(x, k)
    y = jnp.einsum('bkhw,ok->bohw', feat, conv_w[:, :, 0, 0],
                   precision=jax.lax.Precision.HIGHEST)
    y = y + conv_b[None, :, None, None]
    mean = y.mean(axis=(0, 2, 3), keepdims=True)
    var = y.var(axis=(0, 2, 3), keepdims=True)          # biased (train-mode BN)
    yn = (y - mean) / jnp.sqrt(var + eps)
    yn = yn * gamma[None, :, None, None] + beta[None, :, None, None]
    return jnp.where(yn > 0, yn, neg_slope * yn)


# ---------------------------------------------------------------------------
if __name__ == "__main__":
    def check(B, C, H, W, Cout, k, key):
        K = (2 * k - 1) * C
        kx, kw, kb, kg, kbe = jax.random.split(key, 5)
        x = jax.random.normal(kx, (B, C, H, W), dtype=jnp.float32)
        conv_w = 0.1 * jax.random.normal(kw, (Cout, K, 1, 1), dtype=jnp.float32)
        conv_b = 0.1 * jax.random.normal(kb, (Cout,), dtype=jnp.float32)
        gamma = 1.0 + 0.1 * jax.random.normal(kg, (Cout,), dtype=jnp.float32)
        beta = 0.1 * jax.random.normal(kbe, (Cout,), dtype=jnp.float32)

        fwd = jax.jit(functools.partial(hanc_layer, k=k))
        out = jax.block_until_ready(fwd(x, conv_w, conv_b, gamma, beta))
        ref = jax.block_until_ready(reference(x, conv_w, conv_b, gamma, beta, k=k))
        assert out.shape == (B, Cout, H, W), out.shape
        # bf16 matmul operands + bf16 intermediate -> looser tolerance than pure f32.
        err = float(jnp.max(jnp.abs(out - ref)))
        assert jnp.allclose(out, ref, atol=2e-2, rtol=2e-2), err

    key = jax.random.PRNGKey(0)
    k1, k2 = jax.random.split(key)
    check(2, 4, 16, 16, 8, 3, k1)   # even shapes: N=512, no pixel padding
    check(1, 4, 12, 12, 6, 3, k2)   # ragged N=144 (mask path) + Cout not multiple of 8
    print("KERNEL_OK")
</pallas_src>

<mosaic_0001>
module attributes {stable_mosaic.version = 11 : i64} {
  func.func @_conv_stats_kernel(%arg0: i32, %arg1: i32, %arg2: memref<24x256xbf16, #tpu.memory_space<vmem>>, %arg3: memref<8x24xbf16, #tpu.memory_space<vmem>>, %arg4: memref<8x1xf32, #tpu.memory_space<vmem>>, %arg5: memref<8x256xbf16, #tpu.memory_space<vmem>>, %arg6: memref<1x8x1xf32, #tpu.memory_space<vmem>>, %arg7: memref<1x8x1xf32, #tpu.memory_space<vmem>>) attributes {dimension_semantics = [#tpu.dimension_semantics<parallel>, #tpu.dimension_semantics<arbitrary>], iteration_bounds = array<i64: 2, 1>, scalar_prefetch = 0 : i64, scratch_operands = 0 : i64, tpu.core_type = #tpu.core_type<tc>, window_params = [{transform_indices = @transform_0, window_bounds = array<i64: 24, 256>}, {pipeline_mode = #tpu.pipeline_mode<synchronous>, transform_indices = @transform_1, window_bounds = array<i64: 8, 24>}, {pipeline_mode = #tpu.pipeline_mode<synchronous>, transform_indices = @transform_2, window_bounds = array<i64: 8, 1>}, {transform_indices = @transform_3, window_bounds = array<i64: 8, 256>}, {transform_indices = @transform_4, window_bounds = array<i64: 1, 8, 1>}, {transform_indices = @transform_5, window_bounds = array<i64: 1, 8, 1>}]} {
    %c0_i32 = arith.constant 0 : i32
    %0 = arith.cmpi eq, %arg1, %c0_i32 : i32
    %1 = arith.extui %0 : i1 to i32
    %c0_i32_0 = arith.constant 0 : i32
    %2 = arith.cmpi ne, %1, %c0_i32_0 : i32
    scf.if %2 {
      %cst_22 = arith.constant 0.000000e+00 : f32
      %28 = vector.broadcast %cst_22 : f32 to vector<8x1xf32>
      %c0_23 = arith.constant 0 : index
      %c0_24 = arith.constant 0 : index
      %c0_25 = arith.constant 0 : index
      %29 = vector.load %arg6[%c0_23, %c0_24, %c0_25] : memref<1x8x1xf32, #tpu.memory_space<vmem>>, vector<1x8x1xf32>
      %30 = vector.shape_cast %29 : vector<1x8x1xf32> to vector<8x1xf32>
      %31 = vector.shape_cast %28 : vector<8x1xf32> to vector<1x8x1xf32>
      tpu.vector_store %arg6[%c0_23, %c0_24, %c0_25], %31 {strides = array<i32>} : memref<1x8x1xf32, #tpu.memory_space<vmem>>, vector<1x8x1xf32>,
      %cst_26 = arith.constant 0.000000e+00 : f32
      %32 = vector.broadcast %cst_26 : f32 to vector<8x1xf32>
      %c0_27 = arith.constant 0 : index
      %c0_28 = arith.constant 0 : index
      %c0_29 = arith.constant 0 : index
      %33 = vector.load %arg7[%c0_27, %c0_28, %c0_29] : memref<1x8x1xf32, #tpu.memory_space<vmem>>, vector<1x8x1xf32>
      %34 = vector.shape_cast %33 : vector<1x8x1xf32> to vector<8x1xf32>
      %35 = vector.shape_cast %32 : vector<8x1xf32> to vector<1x8x1xf32>
      tpu.vector_store %arg7[%c0_27, %c0_28, %c0_29], %35 {strides = array<i32>} : memref<1x8x1xf32, #tpu.memory_space<vmem>>, vector<1x8x1xf32>,
    } else {
    }
    %c0 = arith.constant 0 : index
    %c0_1 = arith.constant 0 : index
    %3 = vector.load %arg3[%c0, %c0_1] : memref<8x24xbf16, #tpu.memory_space<vmem>>, vector<8x24xbf16>
    %c0_2 = arith.constant 0 : index
    %c0_3 = arith.constant 0 : index
    %4 = vector.load %arg2[%c0_2, %c0_3] : memref<24x256xbf16, #tpu.memory_space<vmem>>, vector<24x256xbf16>
    %cst = arith.constant dense<0.000000e+00> : vector<8x256xf32>
    %5 = tpu.matmul %3, %4, %cst {dimension_numbers = #tpu.dot_dimension_numbers<[1], [0], [0], [1], [0, 0, 1, 1], [], []>} : vector<8x24xbf16>, vector<24x256xbf16>, vector<8x256xf32> -> vector<8x256xf32>
    %c0_4 = arith.constant 0 : index
    %c0_5 = arith.constant 0 : index
    %6 = vector.load %arg4[%c0_4, %c0_5] : memref<8x1xf32, #tpu.memory_space<vmem>>, vector<8x1xf32>
    %7 = vector.broadcast %6 : vector<8x1xf32> to vector<8x256xf32>
    %8 = arith.addf %5, %7 : vector<8x256xf32>
    %9 = arith.truncf %8 : vector<8x256xf32> to vector<8x256xbf16>
    %c0_6 = arith.constant 0 : index
    %c0_7 = arith.constant 0 : index
    %10 = vector.load %arg5[%c0_6, %c0_7] : memref<8x256xbf16, #tpu.memory_space<vmem>>, vector<8x256xbf16>
    tpu.vector_store %arg5[%c0_6, %c0_7], %9 {strides = array<i32>} : memref<8x256xbf16, #tpu.memory_space<vmem>>, vector<8x256xbf16>,
    %c0_8 = arith.constant 0 : index
    %c0_9 = arith.constant 0 : index
    %c0_10 = arith.constant 0 : index
    %11 = vector.load %arg6[%c0_8, %c0_9, %c0_10] : memref<1x8x1xf32, #tpu.memory_space<vmem>>, vector<1x8x1xf32>
    %12 = vector.shape_cast %11 : vector<1x8x1xf32> to vector<8x1xf32>
    %cst_11 = arith.constant dense<0.000000e+00> : vector<8xf32>
    %13 = vector.multi_reduction <add>, %8, %cst_11 [1] : vector<8x256xf32> to vector<8xf32>
    %14 = vector.shape_cast %13 : vector<8xf32> to vector<8x1xf32>
    %15 = arith.addf %12, %14 : vector<8x1xf32>
    %c0_12 = arith.constant 0 : index
    %c0_13 = arith.constant 0 : index
    %c0_14 = arith.constant 0 : index
    %16 = vector.load %arg6[%c0_12, %c0_13, %c0_14] : memref<1x8x1xf32, #tpu.memory_space<vmem>>, vector<1x8x1xf32>
    %17 = vector.shape_cast %16 : vector<1x8x1xf32> to vector<8x1xf32>
    %18 = vector.shape_cast %15 : vector<8x1xf32> to vector<1x8x1xf32>
    tpu.vector_store %arg6[%c0_12, %c0_13, %c0_14], %18 {strides = array<i32>} : memref<1x8x1xf32, #tpu.memory_space<vmem>>, vector<1x8x1xf32>,
    %c0_15 = arith.constant 0 : index
    %c0_16 = arith.constant 0 : index
    %c0_17 = arith.constant 0 : index
    %19 = vector.load %arg7[%c0_15, %c0_16, %c0_17] : memref<1x8x1xf32, #tpu.memory_space<vmem>>, vector<1x8x1xf32>
    %20 = vector.shape_cast %19 : vector<1x8x1xf32> to vector<8x1xf32>
    %21 = arith.mulf %8, %8 : vector<8x256xf32>
    %cst_18 = arith.constant dense<0.000000e+00> : vector<8xf32>
    %22 = vector.multi_reduction <add>, %21, %cst_18 [1] : vector<8x256xf32> to vector<8xf32>
    %23 = vector.shape_cast %22 : vector<8xf32> to vector<8x1xf32>
    %24 = arith.addf %20, %23 : vector<8x1xf32>
    %c0_19 = arith.constant 0 : index
    %c0_20 = arith.constant 0 : index
    %c0_21 = arith.constant 0 : index
    %25 = vector.load %arg7[%c0_19, %c0_20, %c0_21] : memref<1x8x1xf32, #tpu.memory_space<vmem>>, vector<1x8x1xf32>
    %26 = vector.shape_cast %25 : vector<1x8x1xf32> to vector<8x1xf32>
    %27 = vector.shape_cast %24 : vector<8x1xf32> to vector<1x8x1xf32>
    tpu.vector_store %arg7[%c0_19, %c0_20, %c0_21], %27 {strides = array<i32>} : memref<1x8x1xf32, #tpu.memory_space<vmem>>, vector<1x8x1xf32>,
    return
  }
  func.func @transform_0(%arg0: i32, %arg1: i32) -> (i32, i32) {
    %c1_i32 = arith.constant 1 : i32
    %0 = arith.muli %arg0, %c1_i32 : i32
    %1 = arith.addi %0, %arg1 : i32
    %c0_i32 = arith.constant 0 : i32
    %c0_i32_0 = arith.constant 0 : i32
    return %c0_i32, %1 : i32, i32
  }
  func.func @transform_1(%arg0: i32, %arg1: i32) -> (i32, i32) {
    %c0_i32 = arith.constant 0 : i32
    %c0_i32_0 = arith.constant 0 : i32
    %c0_i32_1 = arith.constant 0 : i32
    return %c0_i32, %c0_i32_0 : i32, i32
  }
  func.func @transform_2(%arg0: i32, %arg1: i32) -> (i32, i32) {
    %c0_i32 = arith.constant 0 : i32
    %c0_i32_0 = arith.constant 0 : i32
    %c0_i32_1 = arith.constant 0 : i32
    return %c0_i32, %c0_i32_0 : i32, i32
  }
  func.func @transform_3(%arg0: i32, %arg1: i32) -> (i32, i32) {
    %c1_i32 = arith.constant 1 : i32
    %0 = arith.muli %arg0, %c1_i32 : i32
    %1 = arith.addi %0, %arg1 : i32
    %c0_i32 = arith.constant 0 : i32
    %c0_i32_0 = arith.constant 0 : i32
    return %c0_i32, %1 : i32, i32
  }
  func.func @transform_4(%arg0: i32, %arg1: i32) -> (i32, i32, i32) {
    %c0_i32 = arith.constant 0 : i32
    %c0_i32_0 = arith.constant 0 : i32
    %c0_i32_1 = arith.constant 0 : i32
    return %arg0, %c0_i32, %c0_i32_0 : i32, i32, i32
  }
  func.func @transform_5(%arg0: i32, %arg1: i32) -> (i32, i32, i32) {
    %c0_i32 = arith.constant 0 : i32
    %c0_i32_0 = arith.constant 0 : i32
    %c0_i32_1 = arith.constant 0 : i32
    return %arg0, %c0_i32, %c0_i32_0 : i32, i32, i32
  }
}

module attributes {stable_mosaic.version = 11 : i64} {
  func.func @_bn_act_kernel(%arg0: i32, %arg1: memref<8x512xbf16, #tpu.memory_space<vmem>>, %arg2: memref<8x1xf32, #tpu.memory_space<vmem>>, %arg3: memref<8x1xf32, #tpu.memory_space<vmem>>, %arg4: memref<8x512xbf16, #tpu.memory_space<vmem>>) attributes {dimension_semantics = [#tpu.dimension_semantics<parallel>], iteration_bounds = array<i64: 1>, scalar_prefetch = 0 : i64, scratch_operands = 0 : i64, tpu.core_type = #tpu.core_type<tc>, window_params = [{transform_indices = @transform_0, window_bounds = array<i64: 8, 512>}, {pipeline_mode = #tpu.pipeline_mode<synchronous>, transform_indices = @transform_1, window_bounds = array<i64: 8, 1>}, {pipeline_mode = #tpu.pipeline_mode<synchronous>, transform_indices = @transform_2, window_bounds = array<i64: 8, 1>}, {transform_indices = @transform_3, window_bounds = array<i64: 8, 512>}]} {
    %c0 = arith.constant 0 : index
    %c0_0 = arith.constant 0 : index
    %0 = vector.load %arg1[%c0, %c0_0] : memref<8x512xbf16, #tpu.memory_space<vmem>>, vector<8x512xbf16>
    %1 = arith.extf %0 : vector<8x512xbf16> to vector<8x512xf32>
    %c0_1 = arith.constant 0 : index
    %c0_2 = arith.constant 0 : index
    %2 = vector.load %arg2[%c0_1, %c0_2] : memref<8x1xf32, #tpu.memory_space<vmem>>, vector<8x1xf32>
    %3 = vector.broadcast %2 : vector<8x1xf32> to vector<8x512xf32>
    %4 = arith.mulf %1, %3 : vector<8x512xf32>
    %c0_3 = arith.constant 0 : index
    %c0_4 = arith.constant 0 : index
    %5 = vector.load %arg3[%c0_3, %c0_4] : memref<8x1xf32, #tpu.memory_space<vmem>>, vector<8x1xf32>
    %6 = vector.broadcast %5 : vector<8x1xf32> to vector<8x512xf32>
    %7 = arith.addf %4, %6 : vector<8x512xf32>
    %cst = arith.constant 0.000000e+00 : f32
    %8 = vector.broadcast %cst : f32 to vector<8x512xf32>
    %9 = arith.cmpf ogt, %7, %8 : vector<8x512xf32>
    %cst_5 = arith.constant 0.00999999977 : f32
    %10 = vector.broadcast %cst_5 : f32 to vector<8x512xf32>
    %11 = arith.mulf %10, %7 : vector<8x512xf32>
    %12 = arith.select %9, %7, %11 : vector<8x512xi1>, vector<8x512xf32>
    %13 = arith.truncf %12 : vector<8x512xf32> to vector<8x512xbf16>
    %c0_6 = arith.constant 0 : index
    %c0_7 = arith.constant 0 : index
    %14 = vector.load %arg4[%c0_6, %c0_7] : memref<8x512xbf16, #tpu.memory_space<vmem>>, vector<8x512xbf16>
    tpu.vector_store %arg4[%c0_6, %c0_7], %13 {strides = array<i32>} : memref<8x512xbf16, #tpu.memory_space<vmem>>, vector<8x512xbf16>,
    return
  }
  func.func @transform_0(%arg0: i32) -> (i32, i32) {
    %c0_i32 = arith.constant 0 : i32
    %c0_i32_0 = arith.constant 0 : i32
    return %c0_i32, %arg0 : i32, i32
  }
  func.func @transform_1(%arg0: i32) -> (i32, i32) {
    %c0_i32 = arith.constant 0 : i32
    %c0_i32_0 = arith.constant 0 : i32
    %c0_i32_1 = arith.constant 0 : i32
    return %c0_i32, %c0_i32_0 : i32, i32
  }
  func.func @transform_2(%arg0: i32) -> (i32, i32) {
    %c0_i32 = arith.constant 0 : i32
    %c0_i32_0 = arith.constant 0 : i32
    %c0_i32_1 = arith.constant 0 : i32
    return %c0_i32, %c0_i32_0 : i32, i32
  }
  func.func @transform_3(%arg0: i32) -> (i32, i32) {
    %c0_i32 = arith.constant 0 : i32
    %c0_i32_0 = arith.constant 0 : i32
    return %c0_i32, %arg0 : i32, i32
  }
}

</mosaic_0001>

<bundles_post_ra>
// kernel: hanc_layer.3
= control target key start
LH: loop header
LB: loop body
LE: loop exit
PB: predicated region body
PF: predicated region fallthrough
CT: control target
= control target key end

     0   :  { %v80_v0 = vmov 0   ;;  %s119_s1 = inlined_call_operand.vmem [shape: f32[8,1], index: 1, kind: input, shape index: {}]   ;;  %s120_s2 = inlined_call_operand.vmem [shape: f32[8,1], index: 2, kind: input, shape index: {}]   ;;  %s121_s0 = inlined_call_operand.vmem [shape: bf16[8,512], index: 0, kind: input, shape index: {}, may-alias: {0,3}]   ;;  %s122_s3 = inlined_call_operand.vmem [shape: bf16[8,512], index: 3, kind: output, shape index: {}, may-alias: {0,3}]  }
   0x1   :  { %79 = vset.pattern.permute.xlu0 %v80_v0  ;;  %v20_v1 = vld [vmem:[%s119_s1] sm:$0xff]  ;;  %v15_v4 = vld [vmem:[%s121_s0 + $0x8] sm:$0xff] }
   0x2   :  { %23 = vperm.xlu0 %79, %v20_v1   ;;  %v30_v2 = vld [vmem:[%s120_s2] sm:$0xff]  ;;  %v18_v7 = vunpack.c.l.bf16 %v15_v4  ;;  %v19_v8 = vunpack.c.h.bf16 %v15_v4 }
   0x3   :  { %v14_v3 = vld [vmem:[%s121_s0] sm:$0xff] }
   0x4   :  { %v16_v5 = vunpack.c.l.bf16 %v14_v3  ;;  %v17_v6 = vunpack.c.h.bf16 %v14_v3 }
   0x6   :  { %33 = vperm.xlu0 %79, %v30_v2  }
  0x81   :  { %v24_v9 = vpop.permute.xlu0 %23 }
  0x82   :  { %v26_v10 = vmul.f32 %v24_v9, %v16_v5  ;;  %v27_v11 = vmul.f32 %v24_v9, %v17_v6  ;;  %v28_v12 = vmul.f32 %v24_v9, %v18_v7  ;;  %v29_v13 = vmul.f32 %v24_v9, %v19_v8 }
  0x85   :  { %v34_v14 = vpop.permute.xlu0 %33 }
  0x86   :  { %v36_v15 = vadd.f32 %v34_v14, %v26_v10  ;;  %v37_v16 = vadd.f32 %v34_v14, %v27_v11  ;;  %v38_v17 = vadd.f32 %v34_v14, %v28_v12  ;;  %v39_v18 = vadd.f32 %v34_v14, %v29_v13 }
  0x88   :  { %vm40_vm0 = vcmp.gt.f32.partialorder %v36_v15, 0.0  ;;  %vm41_vm1 = vcmp.gt.f32.partialorder %v37_v16, 0.0  ;;  %vm42_vm2 = vcmp.gt.f32.partialorder %v38_v17, 0.0  ;;  %vm43_vm3 = vcmp.gt.f32.partialorder %v39_v18, 0.0 }
  0x89   :  { %v44_v19 = vmul.f32 0.01, %v36_v15  ;;  %v45_v20 = vmul.f32 0.01, %v37_v16  ;;  %v46_v21 = vmul.f32 0.01, %v38_v17 }
  0x8a   :  { %v47_v22 = vmul.f32 0.01, %v39_v18 }
  0x8b   :  { %v48_v23 = vsel %vm40_vm0, %v36_v15, %v44_v19  ;;  %v49_v24 = vsel %vm41_vm1, %v37_v16, %v45_v20  ;;  %v50_v25 = vsel %vm42_vm2, %v38_v17, %v46_v21 }
  0x8c   :  { %v51_v26 = vsel %vm43_vm3, %v39_v18, %v47_v22  ;;  %v76_v27 = vpack.c.bf16 %v49_v24, %v48_v23 }
  0x8d   :  { %v77_v28 = vpack.c.bf16 %v51_v26, %v50_v25 }
  0x8e   :  { %68 = vst [vmem:[%s122_s3] sm:$0xff] %v76_v27 }
  0x8f   :  { %69 = vst [vmem:[%s122_s3 + $0x8] sm:$0xff] %v77_v28 }

// kernel: hanc_layer.2
= control target key start
LH: loop header
LB: loop body
LE: loop exit
PB: predicated region body
PF: predicated region fallthrough
CT: control target
= control target key end

     0   :  { %s702_s18 = smov 0   ;;  %s704_s19 = smov 0   ;;  %s785_s0 = inlined_call_operand.vmem [shape: bf16[24,512], index: 0, kind: input, shape index: {}]   ;;  %s786_s1 = inlined_call_operand.vmem [shape: bf16[8,24], index: 1, kind: input, shape index: {}]   ;;  %s787_s2 = inlined_call_operand.vmem [shape: f32[8,1], index: 2, kind: input, shape index: {}]   ;;  %s788_s3 = inlined_call_operand.vmem [shape: bf16[8,512], index: 3, kind: output, shape index: {0}]   ;;  %s789_s4 = inlined_call_operand.vmem [shape: f32[2,8,1], index: 4, kind: output, shape index: {1}]   ;;  %s790_s5 = inlined_call_operand.vmem [shape: f32[2,8,1], index: 5, kind: output, shape index: {2}]  }
   0x1   :  { %s706_s20 = smov 0   ;;  %s708_s21 = smov 0  }
   0x2   :  { %s710_s22 = smov 0  }
   0x3 LB: > { %s28_s23 = sadd.s32 1, %s664_s21  ;;  %p44_p1 = scmp.ne.s32.totalorder %s656_s19, %s652_s18  ;;  %s668_s22 = sphi %s710_s22, %s16_s22   ;;  %s664_s21 = sphi %s708_s21, %s794_s21   ;;  %s660_s20 = sphi %s706_s20, %s793_s20   ;;  %s656_s19 = sphi %s704_s19, %s792_s19   ;;  %s652_s18 = sphi %s702_s18, %s791_s18  }
   0x4   : > { %p30_p0 = scmp.ge.s32.totalorder %s28_s23, 2  ;;  %p45_p2 = scmp.eq.s32.totalorder %s668_s22, 0 }
   0x5   : > { %s37_s25 = sadd.s32 1, %s656_s19  ;;  %p561_p5 = scmp.ge.s32.totalorder %s668_s22, 2 }
   0x6   : > { %s796_s23 = smov (%p30_p0, %s28_s23), 0  ;;  %p46_p3 = por %p45_p2, %p44_p1 }
   0x7   : > { %s34_s24 = ssub.s32 %s664_s21, %s796_s23  ;;  %198 = sbr.rel (%p561_p5) target bundleno = 21 (0x15), region = 24 }
   0x8   : > { %p35_p4 = scmp.eq.s32.totalorder %s34_s24, 0 }
   0xa   : > { %s737_s26 = scalar_select %p35_p4, %s656_s19, %s37_s25  }
   0xe   : > { %201 = sbr.rel (!%p46_p3) target bundleno = 21 (0x15), region = 28  ;;  %s203_s27 = sand.u32 (%p46_p3), 1, %s656_s19  }
   0xf   : > { %s578_s28 = sshll.u32 (%p46_p3), %s664_s21, 3  ;;  %s580_s29 = smul.u32 (%p46_p3), 24, %s203_s27 }
  0x10   : > { %s209_s7 = scalar_lea.vmem (%p46_p3), %s785_s0, %s578_s28 }
  0x11   : > { %v241_v0 = vld [vmem:[%s209_s7] sm:$0xff] (%p46_p3)  ;;  %v243_v1 = vld [vmem:[%s209_s7 + $0x10] sm:$0xff] (%p46_p3)  ;;  %s205_s8 = scalar_lea.vmem (%p46_p3), [#allocation2], %s580_s29 }
  0x12   : > { %v245_v2 = vld [vmem:[%s209_s7 + $0x20] sm:$0xff] (%p46_p3)  ;;  %242 = vst [vmem:[%s205_s8] sm:$0xff] (%p46_p3), %v241_v0  ;;  %244 = vst [vmem:[%s205_s8 + $0x8] sm:$0xff] (%p46_p3), %v243_v1 }
  0x13   : > { %246 = vst [vmem:[%s205_s8 + $0x10] sm:$0xff] (%p46_p3), %v245_v2 }
  0x15 PF: > { %p564_p6 = scmp.ge.s32.totalorder %s668_s22, 1  ;;  %p251_p7 = scmp.lt.s32.totalorder %s668_s22, 3 }
  0x17   : > { %p252_p8 = pnand %p564_p6, %p251_p7 }
  0x18   : > { %s258_s9 = sand.u32 (!%p252_p8), 1, %s652_s18   ;;  %v670_v3 = vmov (!%p252_p8), 0   ;;  %v324_v4 = vld [vmem:[%s787_s2] sm:$0xff] (!%p252_p8)  ;;  %vm349_vm0 = vcmask (!%p252_p8), 1043456   ;;  %vm345_vm1 = vcmask (!%p252_p8), 195584   ;;  %p304_p9 = scmp.lt.s32.totalorder (!%p252_p8), %s660_s20, 1 }
  0x19   : > { %255 = sbr.rel (%p252_p8) target bundleno = 402 (0x192), region = 66  ;;  %388 = vmatprep.mubr.bf16.mxu0 (!%p252_p8), %v670_v3  ;;  %624 = vset.pattern.permute.xlu0 (!%p252_p8), %v670_v3  ;;  %v320_v11 = vld [vmem:[%s786_s1] sm:$0xf] (!%p252_p8)  ;;  %vm317_vm2 = vcmask (!%p252_p8), 7168   ;;  %v671_v12 = vmov (!%p252_p8), 0.0   ;;  %s565_s27 = sshll.u32 (!%p252_p8), %s660_s20, 1 }
  0x1a   : > { %s581_s10 = smul.u32 (!%p252_p8), 24, %s258_s9  ;;  %327 = vperm.xlu0 (!%p252_p8), %624, %v324_v4   ;;  %p298_p10 = scmp.lt.s32.totalorder (!%p252_p8), %s565_s27, 3 }
  0x1c   : > { %s260_s13 = scalar_lea.vmem (!%p252_p8), [#allocation2], %s581_s10 }
  0x1d   : > { %v323_v5 = vld [vmem:[%s260_s13 + $0x10] sm:$0xff] (!%p252_p8)  ;;  %v625_v6 = vld [vmem:[%s260_s13 + $0x4] ss:$8 sps:$4 sm:$0xff] (!%p252_p8)   ;;  %v628_v8 = vld [vmem:[%s260_s13] ss:$8 sps:$4 sm:$0xff] (!%p252_p8)  }
  0x1e   : > { %v572_v7 = vcombine.high (!%p252_p8), %v323_v5, %v323_v5  ;;  %v571_v9 = vcombine.low (!%p252_p8), %v323_v5, %v323_v5  ;;  %356 = vmatprep.subr.bf16.mxu0 (!%p252_p8), %v625_v6 }
  0x1f   : > { %357 = vmatpush1.bf16.msra.mxu0 (!%p252_p8), %v628_v8 }
  0x20   : > { %573 = vmatprep.subr.msk.bf16.mxu0 %vm349_vm0, %v572_v7  ;;  %v351_v10 = vsel %vm349_vm0, %v571_v9, 0  ;;  %s305_s16 = scalar_select %p304_p9, %s660_s20, 1 }
  0x21   : > { %s798_s27 = smov (!%p298_p10, %s565_s27), 3 }
  0x22   : > { %s567_s17 = sshll.u32 %s305_s16, 3  ;;  %s566_s28 = sshll.u32 %s798_s27, 2 }
  0x23   : > { %359 = vmatpush1.bf16.msra.mxu0 %v351_v10  ;;  %s307_s25 = scalar_lea.vmem %s789_s4, %s567_s17  ;;  %s301_s6 = scalar_lea.vmem %s788_s3, %s566_s28 }
  0x24   : > { %318 = vst.msk [vmem:[%s307_s25] sm:$0xff] %vm317_vm2, %v671_v12  ;;  %s311_s8 = scalar_lea.vmem %s790_s5, %s567_s17 }
  0x25   : > { %319 = vst.msk [vmem:[%s311_s8] sm:$0xff] %vm317_vm2, %v671_v12 }
  0x26   : > { %574 = vmatmul.mubr.msk.bf16.vlgmr.msra.gmra.mrb[0].mxu0 %vm345_vm1, %v320_v11 }
  0x2b   : > { %v406_v25 = vld [vmem:[%s307_s25] sm:$0xff] }
  0x2c   : > { %v413_v27 = vld [vmem:[%s311_s8] sm:$0xff] }
  0x99   : > { %v328_v13 = vpop.permute.xlu0 %327 }
  0xf9   : > { %v390_v14 = vpop.f32.mrb[0].mxu0 }
  0xfa   : > { %v391_v15 = vadd.f32 %v390_v14, %v328_v13  ;;  %v392_v16 = vpop.f32.mrb[1].mxu0 }
  0xfb   : > { %v393_v17 = vadd.f32 %v392_v16, %v328_v13  ;;  %v394_v18 = vpop.f32.mrb[2].mxu0 }
  0xfc   : > { %v395_v19 = vpop.f32.mrb[3].mxu0  ;;  %v414_v20 = vmul.f32 %v391_v15, %v391_v15 }
  0xfd   : > { %v579_v21 = vpack.c.bf16 %v393_v17, %v391_v15  ;;  %v407_v22 = vadd.f32 %v393_v17, %v391_v15  ;;  %v415_v23 = vmul.f32 %v393_v17, %v393_v17 }
  0xff   : > { %405 = vst [vmem:[%s301_s6] sm:$0xff] %v579_v21  ;;  %408 = vadd.xlane.f32.xlu0 %v407_v22  ;;  %v416_v24 = vadd.f32 %v415_v23, %v414_v20 }
 0x101   : > { %417 = vadd.xlane.f32.xlu1 %v416_v24 }
 0x18c   : > { %v409_v26 = vpop.xlane.xlu0 %408 }
 0x18d   : > { %v410_v28 = vadd.f32 %v409_v26, %v406_v25 }
 0x18e   : > { %v418_v29 = vpop.xlane.xlu1 %417 }
 0x18f   : > { %412 = vst.msk [vmem:[%s307_s25] sm:$0xff] %vm317_vm2, %v410_v28  ;;  %v419_v30 = vadd.f32 %v418_v29, %v413_v27 }
 0x191   : > { %420 = vst.msk [vmem:[%s311_s8] sm:$0xff] %vm317_vm2, %v419_v30 }
 0x192 PF: > { %s16_s22 = sadd.s32 1, %s668_s22   ;;  %s791_s18 = smov %s656_s19 }
 0x193   : > { %p13_p11 = scmp.ge.s32.totalorder %s16_s22, 4   ;;  %s792_s19 = smov %s737_s26 }
 0x194   : > { %s793_s20 = smov %s664_s21  ;;  %s794_s21 = smov %s796_s23 }
 0x195   :  { %15 = sbr.rel (!%p13_p11) target bundleno = 3 (0x3), region = 133 }

</bundles_post_ra>
